<compile_context>
chip_gen: v7x
topology: tpu7x:2x2x1
jax: 0.10.0
libtpu: 0.0.40
codegen_flags: <defaults>
</compile_context>

<pallas_src>
import math

import jax
import jax.numpy as jnp
from jax.experimental import pallas as pl
from jax.experimental.pallas import tpu as pltpu

_SQRT_2_OVER_PI = math.sqrt(2.0 / math.pi)
_GELU_COEFF = 0.044715
_LANE = 128


def _gelu_kernel(x_ref, o_ref):
    x = x_ref[...]
    xf = x.astype(jnp.float32)
    inner = _SQRT_2_OVER_PI * (xf + _GELU_COEFF * xf * xf * xf)
    y = 0.5 * xf * (1.0 + jnp.tanh(inner))
    o_ref[...] = y.astype(o_ref.dtype)


def _round_up(a, b):
    return ((a + b - 1) // b) * b


def _sublane_multiple(dtype):
    # f32 -> 8, bf16/f16 -> 16, int8/fp8 -> 32 (packed sublanes)
    itemsize = jnp.dtype(dtype).itemsize
    return max(8, 8 * (4 // max(1, itemsize)))


def _budgets():
    """Per-generation (scoped-VMEM limit) cap, from trace-time hardware info."""
    cap = 64 << 20
    try:
        info = pltpu.get_tpu_info()
        cap = int(getattr(info, "vmem_capacity_bytes", cap))
    except Exception:
        pass
    if cap >= (96 << 20):       # v5e / v6e: 128 MiB physical VMEM
        return 64 << 20
    return 44 << 20             # v7x: 64 MiB per TensorCore


def _pick_block_elems(itemsize, limit_cap):
    # Per-element VMEM footprint: double-buffered input + output in the native
    # dtype (4*itemsize) plus headroom for ~3 full-block f32 intermediates.
    per_elem = 4 * itemsize + 3 * 4
    budget = (limit_cap * 85) // 100 - (4 << 20)
    return max(64 * 1024, budget // per_elem)


def _vmem_limit(block_elems, itemsize, limit_cap):
    need = block_elems * (4 * itemsize + 3 * 4) + (4 << 20)
    return int(min(limit_cap, max(24 << 20, need)))


def _gelu_direct(x):
    """Zero-copy path: tile the original array; last dim is a 128 multiple."""
    limit_cap = _budgets()
    dtype = x.dtype
    itemsize = jnp.dtype(dtype).itemsize
    sub = _sublane_multiple(dtype)
    block_elems = _pick_block_elems(itemsize, limit_cap)

    shape = x.shape
    lead = shape[:-2]
    R, C = shape[-2], shape[-1]

    # Free collapse: if each (R, C) slab is small and sublane-aligned, merging
    # leading dims into the row axis keeps the (sub, 128) HBM tiling
    # bit-identical (relayout-free reshape) and yields large lane-dense blocks.
    if lead and R % sub == 0 and R * C < block_elems:
        return _gelu_direct(x.reshape(-1, C))

    n_lead = math.prod(lead) if lead else 1

    rows_budget = max(sub, (block_elems // C) // sub * sub)
    block_rows = R if R <= rows_budget else rows_budget
    grid_r = pl.cdiv(R, block_rows)

    # v7x megacore: >= 2 grid steps per TensorCore (>= 4 total) so each core
    # double-buffers; negligible cost on single-TC v5e/v6e.
    total_bytes = x.size * itemsize
    if total_bytes > (2 << 20) and n_lead * grid_r < 4:
        want_r = pl.cdiv(4, n_lead)
        br = min(R, max(sub, _round_up(pl.cdiv(R, want_r), sub)))
        if br < block_rows:
            block_rows = br
            grid_r = pl.cdiv(R, block_rows)

    block_shape = (1,) * len(lead) + (block_rows, C)
    lead_dims = lead

    def index_map(li, ri):
        idx = []
        rem = li
        for s in reversed(lead_dims):
            idx.append(rem % s)
            rem = rem // s
        return tuple(reversed(idx)) + (ri, 0)

    return pl.pallas_call(
        _gelu_kernel,
        out_shape=jax.ShapeDtypeStruct(shape, dtype),
        grid=(n_lead, grid_r),
        in_specs=[pl.BlockSpec(block_shape, index_map)],
        out_specs=pl.BlockSpec(block_shape, index_map),
        compiler_params=pltpu.CompilerParams(
            dimension_semantics=("parallel", "parallel"),
            vmem_limit_bytes=_vmem_limit(block_rows * C, itemsize, limit_cap),
        ),
    )(x)


def _gelu_repack(x):
    """Fallback for small / non-128-multiple last dims: lane-dense re-tiling."""
    limit_cap = _budgets()
    dtype = x.dtype
    itemsize = jnp.dtype(dtype).itemsize
    sub = _sublane_multiple(dtype)
    block_elems = _pick_block_elems(itemsize, limit_cap)
    n = int(x.size)

    cols = 1024 if n >= 1024 * sub else _LANE
    rows = pl.cdiv(n, cols)              # minimal padding: < one row of zeros
    pad = rows * cols - n

    rows_budget = max(sub, (block_elems // cols) // sub * sub)
    block_rows = rows if rows <= rows_budget else rows_budget
    grid_r = pl.cdiv(rows, block_rows)

    # v7x megacore: >= 4 grid steps on non-trivial inputs (>= 2 per core).
    if n * itemsize > (2 << 20) and grid_r < 4:
        block_rows = min(rows, max(sub, _round_up(pl.cdiv(rows, 4), sub)))
        grid_r = pl.cdiv(rows, block_rows)

    flat = x.reshape(-1)
    if pad:
        flat = jnp.pad(flat, (0, pad))   # gelu(0) == 0; sliced off below
    x2 = flat.reshape(rows, cols)

    out2 = pl.pallas_call(
        _gelu_kernel,
        out_shape=jax.ShapeDtypeStruct((rows, cols), dtype),
        grid=(grid_r,),
        in_specs=[pl.BlockSpec((block_rows, cols), lambda i: (i, 0))],
        out_specs=pl.BlockSpec((block_rows, cols), lambda i: (i, 0)),
        # The staged (rows, cols) buffer is dead after the call: write in place.
        input_output_aliases={0: 0},
        compiler_params=pltpu.CompilerParams(
            dimension_semantics=("parallel",),
            vmem_limit_bytes=_vmem_limit(block_rows * cols, itemsize, limit_cap),
        ),
    )(x2)

    out = out2.reshape(-1)
    if pad:
        out = out[:n]
    return out


def gelu(x):
    """Tanh-approximation GELU (matches the PyTorch module's forward)."""
    orig_shape = x.shape
    if int(x.size) == 0:
        return x
    x2d = x if x.ndim >= 2 else x.reshape(1, -1)   # free: add leading singleton
    C = x2d.shape[-1]
    itemsize = jnp.dtype(x.dtype).itemsize
    sub = _sublane_multiple(x.dtype)
    block_elems = _pick_block_elems(itemsize, _budgets())

    if C % _LANE == 0 and C * sub <= block_elems:
        out = _gelu_direct(x2d)
    else:
        out = _gelu_repack(x2d)
    return out.reshape(orig_shape)


def _gelu_ref(x):
    xf = x.astype(jnp.float32)
    y = 0.5 * xf * (1.0 + jnp.tanh(_SQRT_2_OVER_PI * (xf + _GELU_COEFF * xf**3)))
    return y.astype(x.dtype)


if __name__ == "__main__":
    key = jax.random.PRNGKey(0)
    keys = jax.random.split(key, 4)

    # 1) Lane-aligned transformer MLP activation -> zero-copy direct path.
    xa = jax.random.normal(keys[0], (2, 8, 128), dtype=jnp.float32)
    ya = gelu(xa)
    jax.block_until_ready(ya)
    assert ya.shape == xa.shape and ya.dtype == xa.dtype
    assert jnp.allclose(ya, _gelu_ref(xa), atol=1e-5, rtol=1e-5), "direct path mismatch"

    # 2) Small non-aligned hidden dim -> repack path, no padding needed.
    xb = jax.random.normal(keys[1], (2, 8, 32), dtype=jnp.float32)
    yb = gelu(xb)
    jax.block_until_ready(yb)
    assert yb.shape == xb.shape and yb.dtype == xb.dtype
    assert jnp.allclose(yb, _gelu_ref(xb), atol=1e-5, rtol=1e-5), "repack path mismatch"

    # 3) Non-divisible shape -> repack path with (minimal) tail padding.
    xc = jax.random.normal(keys[2], (5, 37), dtype=jnp.float32)
    yc = gelu(xc)
    jax.block_until_ready(yc)
    assert yc.shape == xc.shape and yc.dtype == xc.dtype
    assert jnp.allclose(yc, _gelu_ref(xc), atol=1e-5, rtol=1e-5), "padded path mismatch"

    # 4) bf16 input, lane-aligned -> direct path with 16-row sublane tiling.
    xd = jax.random.normal(keys[3], (4, 16, 128), dtype=jnp.bfloat16)
    yd = gelu(xd)
    jax.block_until_ready(yd)
    assert yd.shape == xd.shape and yd.dtype == xd.dtype
    assert jnp.allclose(yd.astype(jnp.float32), _gelu_ref(xd).astype(jnp.float32),
                        atol=2e-2, rtol=2e-2), "bf16 mismatch"

    print("KERNEL_OK")
</pallas_src>

<mosaic_0001>
module attributes {stable_mosaic.version = 11 : i64} {
  func.func @_gelu_kernel(%arg0: i32, %arg1: i32, %arg2: memref<16x128xf32, #tpu.memory_space<vmem>>, %arg3: memref<16x128xf32, #tpu.memory_space<vmem>>) attributes {dimension_semantics = [#tpu.dimension_semantics<parallel>, #tpu.dimension_semantics<parallel>], iteration_bounds = array<i64: 1, 1>, scalar_prefetch = 0 : i64, scratch_operands = 0 : i64, tpu.core_type = #tpu.core_type<tc>, window_params = [{transform_indices = @transform_0, window_bounds = array<i64: 16, 128>}, {transform_indices = @transform_1, window_bounds = array<i64: 16, 128>}]} {
    %c0 = arith.constant 0 : index
    %c0_0 = arith.constant 0 : index
    %0 = vector.load %arg2[%c0, %c0_0] : memref<16x128xf32, #tpu.memory_space<vmem>>, vector<16x128xf32>
    %cst = arith.constant 4.471500e-02 : f32
    %1 = vector.broadcast %cst : f32 to vector<16x128xf32>
    %2 = arith.mulf %1, %0 : vector<16x128xf32>
    %3 = arith.mulf %2, %0 : vector<16x128xf32>
    %4 = arith.mulf %3, %0 : vector<16x128xf32>
    %5 = arith.addf %0, %4 : vector<16x128xf32>
    %cst_1 = arith.constant 0.797884583 : f32
    %6 = vector.broadcast %cst_1 : f32 to vector<16x128xf32>
    %7 = arith.mulf %6, %5 : vector<16x128xf32>
    %cst_2 = arith.constant 5.000000e-01 : f32
    %8 = vector.broadcast %cst_2 : f32 to vector<16x128xf32>
    %9 = arith.mulf %8, %0 : vector<16x128xf32>
    %10 = math.tanh %7 : vector<16x128xf32>
    %cst_3 = arith.constant 1.000000e+00 : f32
    %11 = vector.broadcast %cst_3 : f32 to vector<16x128xf32>
    %12 = arith.addf %11, %10 : vector<16x128xf32>
    %13 = arith.mulf %9, %12 : vector<16x128xf32>
    %c0_4 = arith.constant 0 : index
    %c0_5 = arith.constant 0 : index
    %14 = vector.load %arg3[%c0_4, %c0_5] : memref<16x128xf32, #tpu.memory_space<vmem>>, vector<16x128xf32>
    tpu.vector_store %arg3[%c0_4, %c0_5], %13 {strides = array<i32>} : memref<16x128xf32, #tpu.memory_space<vmem>>, vector<16x128xf32>,
    return
  }
  func.func @transform_0(%arg0: i32, %arg1: i32) -> (i32, i32) {
    %c0_i32 = arith.constant 0 : i32
    %c0_i32_0 = arith.constant 0 : i32
    return %arg1, %c0_i32 : i32, i32
  }
  func.func @transform_1(%arg0: i32, %arg1: i32) -> (i32, i32) {
    %c0_i32 = arith.constant 0 : i32
    %c0_i32_0 = arith.constant 0 : i32
    return %arg1, %c0_i32 : i32, i32
  }
}

</mosaic_0001>

<bundles_post_ra>
// kernel: tpu_custom_call.1
= control target key start
LH: loop header
LB: loop body
LE: loop exit
PB: predicated region body
PF: predicated region fallthrough
CT: control target
= control target key end

     0   :  { %6 = vsyncpa [#allocation3], 0  ;;  %s162_s0 = inlined_call_operand.hbm [shape: f32[16,128], index: 0, kind: input, shape index: {}]   ;;  %s163_s1 = inlined_call_operand.hbm [shape: f32[16,128], index: 1, kind: output, shape index: {}]  }
   0x1   :  { %7 = vsyncpa [#allocation4], 0  ;;  %s118_s6 = smov [#allocation2]   ;;  %s70_s10 = scalar_lea.hbm %s162_s0, 256 }
   0x2   :  { %s13_s7 = sshll.u32 %s118_s6, 4  ;;  %p71_p0 = scmp.ne.s32.totalorder %s162_s0, %s70_s10  ;;  %s14_s7 = int_to_ptr.vmem [resolvable:$true] %s13_s7 }
   0x3   :  { %p74_p1 = scmp.lt.u32.totalorder %s70_s10, %s162_s0 }
   0x5   :  { %p76_p2 = pnand %p74_p1, %p71_p0 }
   0x7   :  { %79 = shalt.err (!%p76_p2)
}
   0x8   :  { %s80_s15 = scalar_lea.vmem %s14_s7, 256  ;;  %p85_p4 = scmp.lt.s32.totalorder %s14_s7, %s14_s7 }
   0x9   :  { %p81_p3 = scmp.ne.s32.totalorder %s14_s7, %s80_s15  ;;  %p86_p5 = scmp.lt.s32.totalorder %s80_s15, %s80_s15 }
   0xb   :  { %p87_p6 = por %p86_p5, %p85_p4 }
   0xd   :  { %p88_p7 = pnand %p87_p6, %p81_p3 }
   0xf   :  { %91 = shalt.err (!%p88_p7)
}
  0x10   :  { %s119_s16 = smov 128   ;;  %s120_s17 = smov 8  }
  0x11   :  { %19 = dma.hbm_to_vmem [thread:$0]  %s162_s0, 256, %s14_s7, [#allocation3], %s119_s16, %s119_s16, %s120_s17  }
  0x12   :  { %114 = dma.done.wait [#allocation3], 256  }
  0x13   :  { %115 = vsyncadd [#allocation3], 4294967040  ;;  %v23_v0 = vld [vmem:[#allocation2] sm:$0xff]  ;;  %v24_v1 = vld [vmem:[#allocation2 + $0x8] sm:$0xff]  ;;  %s121_s0 = smov [#allocation5]  }
  0x14   :  { %v25_v2 = vmul.f32 0.044715, %v23_v0  ;;  %v26_v3 = vmul.f32 0.044715, %v24_v1  ;;  %v35_v12 = vmul.f32 0.5, %v23_v0  ;;  %v36_v14 = vmul.f32 0.5, %v24_v1 }
  0x15   :  { %s50_s20 = sshll.u32 %s121_s0, 4  ;;  %s51_s20 = int_to_ptr.vmem [resolvable:$true] %s50_s20 }
  0x16   :  { %v27_v4 = vmul.f32 %v25_v2, %v23_v0  ;;  %v28_v5 = vmul.f32 %v26_v3, %v24_v1  ;;  %s92_s21 = scalar_lea.vmem %s51_s20, 256  ;;  %p97_p9 = scmp.lt.s32.totalorder %s51_s20, %s51_s20 }
  0x17   :  { %p93_p8 = scmp.ne.s32.totalorder %s51_s20, %s92_s21  ;;  %p98_p10 = scmp.lt.s32.totalorder %s92_s21, %s92_s21 }
  0x18   :  { %v29_v6 = vmul.f32 %v27_v4, %v23_v0  ;;  %v30_v7 = vmul.f32 %v28_v5, %v24_v1 }
  0x19   :  { %p99_p11 = por %p98_p10, %p97_p9 }
  0x1a   :  { %v31_v8 = vadd.f32 %v29_v6, %v23_v0  ;;  %v32_v9 = vadd.f32 %v30_v7, %v24_v1 }
  0x1b   :  { %p100_p12 = pnand %p99_p11, %p93_p8 }
  0x1c   :  { %v33_v10 = vmul.f32 0.7978846, %v31_v8  ;;  %v34_v11 = vmul.f32 0.7978846, %v32_v9 }
  0x1e   :  { %66 = vtanh.f32 %v33_v10 }
  0x1f   :  { %68 = vtanh.f32 %v34_v11 }
  0x28   :  { %v67_v13 = vpop.eup %66 }
  0x29   :  { %v69_v15 = vpop.eup %68  ;;  %v39_v16 = vadd.f32 1.0, %v67_v13 }
  0x2a   :  { %v40_v17 = vadd.f32 1.0, %v69_v15 }
  0x2b   :  { %v41_v18 = vmul.f32 %v39_v16, %v35_v12 }
  0x2c   :  { %v42_v19 = vmul.f32 %v40_v17, %v36_v14 }
  0x2d   :  { %43 = vst [vmem:[#allocation5] sm:$0xff] %v41_v18 }
  0x2e   :  { %44 = vst [vmem:[#allocation5 + $0x8] sm:$0xff] %v42_v19 }
  0x2f   :  { %103 = shalt.err (!%p100_p12)
}
  0x30   :  { %s104_s24 = scalar_lea.hbm %s163_s1, 256 }
  0x31   :  { %p105_p13 = scmp.ne.s32.totalorder %s163_s1, %s104_s24  ;;  %p108_p0 = scmp.lt.u32.totalorder %s104_s24, %s163_s1 }
  0x33   :  { %p110_p1 = pnand %p108_p0, %p105_p13 }
  0x35   :  { %113 = shalt.err (!%p110_p1)
}
  0x36   :  { %56 = dma.vmem_to_hbm [thread:$0]  %s51_s20, 256, %s163_s1, [#allocation4], %s119_s16, %s119_s16, %s120_s17  }
  0x37   :  { %116 = dma.done.wait [#allocation4], 256  }
  0x38   :  { %117 = vsyncadd [#allocation4], 4294967040 }
  0x39   :  { %60 = vsyncpa [#allocation3], 1 }
  0x3a   :  { %61 = vsyncpa [#allocation4], 1 }

</bundles_post_ra>
